<compile_context>
chip_gen: v7x
topology: tpu7x:2x2x1
jax: 0.10.0
libtpu: 0.0.40
codegen_flags: <defaults>
</compile_context>

<pallas_src>
import functools

import jax
import jax.numpy as jnp
from jax import lax
from jax.experimental import pallas as pl
from jax.experimental.pallas import tpu as pltpu


# -----------------------------------------------------------------------------
# Kernels
# -----------------------------------------------------------------------------

def _vmem_gather_kernel(ids_ref, table_ref, out_ref, *, unroll):
    """Fast path: table is VMEM-resident; gather rows with dynamic VMEM loads."""
    tm = out_ref.shape[0]
    base = pl.program_id(0) * tm

    def body(r, carry):
        tok = ids_ref[base + r]                                   # SMEM scalar read
        out_ref[pl.ds(r, 1), :] = table_ref[pl.ds(tok, 1), :]     # 1 vld + 1 vst per row
        return carry

    lax.fori_loop(0, tm, body, 0, unroll=unroll)


def _hbm_gather_kernel(ids_ref, table_hbm, out_ref, sem, *, unroll):
    """Large-vocab path: per-row HBM DMAs straight into the pipelined output block."""
    tm = out_ref.shape[0]
    base = pl.program_id(0) * tm

    def issue(r, carry):
        tok = ids_ref[base + r]
        pltpu.make_async_copy(
            table_hbm.at[pl.ds(tok, 1)],      # (1, V) row in HBM
            out_ref.at[pl.ds(r, 1)],          # (1, V) row of the output block (no bounce buf)
            sem.at[0],
        ).start()
        return carry

    # Issue every descriptor (and do every SMEM id read) before the wait.
    lax.fori_loop(0, tm, issue, 0, unroll=unroll)

    # DMA semaphores accumulate bytes: the tm row copies above total tm*V*itemsize bytes,
    # exactly the size of this single (tm, V) descriptor, so one wait drains them all.
    # (Requires tm <= V so the slice is a valid descriptor -- asserted in the wrapper.)
    pltpu.make_async_copy(table_hbm.at[pl.ds(0, tm)], out_ref, sem.at[0]).wait()


# -----------------------------------------------------------------------------
# Tiling helper
# -----------------------------------------------------------------------------

def _choose_row_tile(n, row_bytes, sublane, vmem_budget, cap):
    """Largest multiple of `sublane` dividing n whose double-buffered output block fits
    `vmem_budget`, preferring >= 4 grid steps, then >= 2, else a single block."""
    fit = max(sublane, (vmem_budget // (2 * row_bytes)) // sublane * sublane)
    hi = min(cap, fit, n)
    cands = [d for d in range(sublane, hi + 1, sublane) if n % d == 0]
    if not cands:  # unreachable (n is padded to a multiple of sublane), kept for safety
        return min(n, max(sublane, hi))
    for steps in (4, 2):
        ok = [d for d in cands if n // d >= steps]
        if ok:
            return max(ok)
    return max(cands)


# -----------------------------------------------------------------------------
# Forward wrapper
# -----------------------------------------------------------------------------

def bigram_forward(idx, table, *, resident_table_bytes=16 << 20,
                   out_vmem_budget=8 << 20, force_hbm=False):
    """idx: (B, T) integer tokens, table: (V, V) float -> logits (B, T, V)."""
    B, T = idx.shape
    V, V2 = table.shape
    assert V == V2, "bigram embedding table must be (vocab, vocab)"

    itemsize = jnp.dtype(table.dtype).itemsize
    row_bytes = V * itemsize
    sublane = 8 * max(1, 4 // itemsize)          # f32: 8, bf16: 16, int8: 32 rows / tile

    N = B * T
    n_pad = int(pl.cdiv(N, sublane)) * sublane   # pad rows so tm is always sublane-aligned

    ids = idx.reshape(N).astype(jnp.int32)
    ids = jnp.clip(ids, 0, V - 1)                # avoid OOB DMA / OOB VMEM read
    if n_pad != N:
        ids = jnp.concatenate([ids, jnp.zeros((n_pad - N,), jnp.int32)])

    table_fits_vmem = (V * V * itemsize <= resident_table_bytes) and not force_hbm

    if table_fits_vmem:
        tm = _choose_row_tile(n_pad, row_bytes, sublane, out_vmem_budget, cap=1024)
        unroll = True if tm <= 64 else 8
        kernel = functools.partial(_vmem_gather_kernel, unroll=unroll)
        # Constant index_map -> the table block stays resident in VMEM across the grid.
        in_specs = [pl.BlockSpec((V, V), lambda i, ids: (0, 0))]
        scratch = []
        vmem_need = 2 * V * V * itemsize + 2 * tm * row_bytes
        bytes_accessed = V * V * itemsize + n_pad * row_bytes + n_pad * 4
    else:
        tm = _choose_row_tile(n_pad, row_bytes, sublane, 2 * out_vmem_budget, cap=1024)
        assert tm <= V, "row tile must not exceed vocab rows (aggregated wait descriptor)"
        unroll = True if tm <= 64 else 8
        kernel = functools.partial(_hbm_gather_kernel, unroll=unroll)
        in_specs = [pl.BlockSpec(memory_space=pl.ANY)]   # table stays in HBM
        scratch = [pltpu.SemaphoreType.DMA((1,))]
        vmem_need = 2 * tm * row_bytes
        bytes_accessed = 2 * n_pad * row_bytes + n_pad * 4

    # Explicit VMEM limit: keeps the largest tm compiling under v5e's 16 MiB scoped
    # default and stays comfortably under v7x's 64 MiB physical VMEM.
    vmem_limit = int(min(max(vmem_need + (4 << 20), 16 << 20), 48 << 20))

    out_flat = pl.pallas_call(
        kernel,
        out_shape=jax.ShapeDtypeStruct((n_pad, V), table.dtype),
        grid_spec=pltpu.PrefetchScalarGridSpec(
            num_scalar_prefetch=1,                                # ids -> SMEM scalar path
            grid=(n_pad // tm,),
            in_specs=in_specs,
            out_specs=pl.BlockSpec((tm, V), lambda i, ids: (i, 0)),  # lane-dense output tile
            scratch_shapes=scratch,
        ),
        compiler_params=pltpu.CompilerParams(
            dimension_semantics=("parallel",),                    # shard grid across TCs (v7x)
            vmem_limit_bytes=vmem_limit,
        ),
        cost_estimate=pl.CostEstimate(
            flops=0, transcendentals=0, bytes_accessed=int(bytes_accessed)),
    )(ids, table)

    return out_flat[:N].reshape(B, T, V)


# TODO(synk): generate() (autoregressive multinomial sampling loop) is host-side control
# flow, not a kernel hot path; only the forward lookup is implemented here.


if __name__ == "__main__":
    # Small, deterministic setup: vocab_size = 128, B = 2, T = 8.
    vocab_size = 128
    B, T = 2, 8

    key = jax.random.PRNGKey(0)
    k_table, k_idx = jax.random.split(key)

    # nn.Embedding default init: N(0, 1)
    table = jax.random.normal(k_table, (vocab_size, vocab_size), dtype=jnp.float32)
    idx = jax.random.randint(k_idx, (B, T), 0, vocab_size, dtype=jnp.int32)

    ref = jnp.take(table, idx, axis=0)  # (B, T, V)

    # Path 1: small-vocab fast path (VMEM-resident table).
    logits = jax.block_until_ready(bigram_forward(idx, table))
    assert logits.shape == (B, T, vocab_size), logits.shape
    assert jnp.allclose(logits, ref, atol=1e-6, rtol=1e-6), "VMEM fast path mismatch"

    # Path 2: large-vocab HBM-gather path, exercised at the same small shapes.
    logits_hbm = jax.block_until_ready(bigram_forward(idx, table, force_hbm=True))
    assert jnp.allclose(logits_hbm, ref, atol=1e-6, rtol=1e-6), "HBM gather path mismatch"

    print("KERNEL_OK")
</pallas_src>

<mosaic_0001>
module attributes {stable_mosaic.version = 11 : i64} {
  func.func @_vmem_gather_kernel(%arg0: i32, %arg1: memref<16xi32, #tpu.memory_space<smem>>, %arg2: memref<128x128xf32, #tpu.memory_space<vmem>>, %arg3: memref<8x128xf32, #tpu.memory_space<vmem>>) attributes {dimension_semantics = [#tpu.dimension_semantics<parallel>], iteration_bounds = array<i64: 2>, scalar_prefetch = 1 : i64, scratch_operands = 0 : i64, tpu.core_type = #tpu.core_type<tc>, window_params = [{pipeline_mode = #tpu.pipeline_mode<synchronous>, transform_indices = @transform_0, window_bounds = array<i64: 128, 128>}, {transform_indices = @transform_1, window_bounds = array<i64: 8, 128>}]} {
    %c8_i32 = arith.constant 8 : i32
    %0 = arith.muli %arg0, %c8_i32 : i32
    %c0_i32 = arith.constant 0 : i32
    %1 = arith.addi %0, %c0_i32 : i32
    %2 = arith.index_cast %1 : i32 to index
    %3 = memref.load %arg1[%2] : memref<16xi32, #tpu.memory_space<smem>>
    %4 = arith.index_cast %3 : i32 to index
    %c0 = arith.constant 0 : index
    %5 = vector.load %arg2[%4, %c0] : memref<128x128xf32, #tpu.memory_space<vmem>>, vector<1x128xf32>
    %6 = arith.index_cast %c0_i32 : i32 to index
    %c0_0 = arith.constant 0 : index
    %7 = vector.load %arg3[%6, %c0_0] : memref<8x128xf32, #tpu.memory_space<vmem>>, vector<1x128xf32>
    tpu.vector_store %arg3[%6, %c0_0], %5 {strides = array<i32>} : memref<8x128xf32, #tpu.memory_space<vmem>>, vector<1x128xf32>,
    %c1_i32 = arith.constant 1 : i32
    %8 = arith.addi %0, %c1_i32 : i32
    %9 = arith.index_cast %8 : i32 to index
    %10 = memref.load %arg1[%9] : memref<16xi32, #tpu.memory_space<smem>>
    %11 = arith.index_cast %10 : i32 to index
    %c0_1 = arith.constant 0 : index
    %12 = vector.load %arg2[%11, %c0_1] : memref<128x128xf32, #tpu.memory_space<vmem>>, vector<1x128xf32>
    %13 = arith.index_cast %c1_i32 : i32 to index
    %c0_2 = arith.constant 0 : index
    %14 = vector.load %arg3[%13, %c0_2] : memref<8x128xf32, #tpu.memory_space<vmem>>, vector<1x128xf32>
    tpu.vector_store %arg3[%13, %c0_2], %12 {strides = array<i32>} : memref<8x128xf32, #tpu.memory_space<vmem>>, vector<1x128xf32>,
    %c2_i32 = arith.constant 2 : i32
    %15 = arith.addi %0, %c2_i32 : i32
    %16 = arith.index_cast %15 : i32 to index
    %17 = memref.load %arg1[%16] : memref<16xi32, #tpu.memory_space<smem>>
    %18 = arith.index_cast %17 : i32 to index
    %c0_3 = arith.constant 0 : index
    %19 = vector.load %arg2[%18, %c0_3] : memref<128x128xf32, #tpu.memory_space<vmem>>, vector<1x128xf32>
    %20 = arith.index_cast %c2_i32 : i32 to index
    %c0_4 = arith.constant 0 : index
    %21 = vector.load %arg3[%20, %c0_4] : memref<8x128xf32, #tpu.memory_space<vmem>>, vector<1x128xf32>
    tpu.vector_store %arg3[%20, %c0_4], %19 {strides = array<i32>} : memref<8x128xf32, #tpu.memory_space<vmem>>, vector<1x128xf32>,
    %c3_i32 = arith.constant 3 : i32
    %22 = arith.addi %0, %c3_i32 : i32
    %23 = arith.index_cast %22 : i32 to index
    %24 = memref.load %arg1[%23] : memref<16xi32, #tpu.memory_space<smem>>
    %25 = arith.index_cast %24 : i32 to index
    %c0_5 = arith.constant 0 : index
    %26 = vector.load %arg2[%25, %c0_5] : memref<128x128xf32, #tpu.memory_space<vmem>>, vector<1x128xf32>
    %27 = arith.index_cast %c3_i32 : i32 to index
    %c0_6 = arith.constant 0 : index
    %28 = vector.load %arg3[%27, %c0_6] : memref<8x128xf32, #tpu.memory_space<vmem>>, vector<1x128xf32>
    tpu.vector_store %arg3[%27, %c0_6], %26 {strides = array<i32>} : memref<8x128xf32, #tpu.memory_space<vmem>>, vector<1x128xf32>,
    %c4_i32 = arith.constant 4 : i32
    %29 = arith.addi %0, %c4_i32 : i32
    %30 = arith.index_cast %29 : i32 to index
    %31 = memref.load %arg1[%30] : memref<16xi32, #tpu.memory_space<smem>>
    %32 = arith.index_cast %31 : i32 to index
    %c0_7 = arith.constant 0 : index
    %33 = vector.load %arg2[%32, %c0_7] : memref<128x128xf32, #tpu.memory_space<vmem>>, vector<1x128xf32>
    %34 = arith.index_cast %c4_i32 : i32 to index
    %c0_8 = arith.constant 0 : index
    %35 = vector.load %arg3[%34, %c0_8] : memref<8x128xf32, #tpu.memory_space<vmem>>, vector<1x128xf32>
    tpu.vector_store %arg3[%34, %c0_8], %33 {strides = array<i32>} : memref<8x128xf32, #tpu.memory_space<vmem>>, vector<1x128xf32>,
    %c5_i32 = arith.constant 5 : i32
    %36 = arith.addi %0, %c5_i32 : i32
    %37 = arith.index_cast %36 : i32 to index
    %38 = memref.load %arg1[%37] : memref<16xi32, #tpu.memory_space<smem>>
    %39 = arith.index_cast %38 : i32 to index
    %c0_9 = arith.constant 0 : index
    %40 = vector.load %arg2[%39, %c0_9] : memref<128x128xf32, #tpu.memory_space<vmem>>, vector<1x128xf32>
    %41 = arith.index_cast %c5_i32 : i32 to index
    %c0_10 = arith.constant 0 : index
    %42 = vector.load %arg3[%41, %c0_10] : memref<8x128xf32, #tpu.memory_space<vmem>>, vector<1x128xf32>
    tpu.vector_store %arg3[%41, %c0_10], %40 {strides = array<i32>} : memref<8x128xf32, #tpu.memory_space<vmem>>, vector<1x128xf32>,
    %c6_i32 = arith.constant 6 : i32
    %43 = arith.addi %0, %c6_i32 : i32
    %44 = arith.index_cast %43 : i32 to index
    %45 = memref.load %arg1[%44] : memref<16xi32, #tpu.memory_space<smem>>
    %46 = arith.index_cast %45 : i32 to index
    %c0_11 = arith.constant 0 : index
    %47 = vector.load %arg2[%46, %c0_11] : memref<128x128xf32, #tpu.memory_space<vmem>>, vector<1x128xf32>
    %48 = arith.index_cast %c6_i32 : i32 to index
    %c0_12 = arith.constant 0 : index
    %49 = vector.load %arg3[%48, %c0_12] : memref<8x128xf32, #tpu.memory_space<vmem>>, vector<1x128xf32>
    tpu.vector_store %arg3[%48, %c0_12], %47 {strides = array<i32>} : memref<8x128xf32, #tpu.memory_space<vmem>>, vector<1x128xf32>,
    %c7_i32 = arith.constant 7 : i32
    %50 = arith.addi %0, %c7_i32 : i32
    %51 = arith.index_cast %50 : i32 to index
    %52 = memref.load %arg1[%51] : memref<16xi32, #tpu.memory_space<smem>>
    %53 = arith.index_cast %52 : i32 to index
    %c0_13 = arith.constant 0 : index
    %54 = vector.load %arg2[%53, %c0_13] : memref<128x128xf32, #tpu.memory_space<vmem>>, vector<1x128xf32>
    %55 = arith.index_cast %c7_i32 : i32 to index
    %c0_14 = arith.constant 0 : index
    %56 = vector.load %arg3[%55, %c0_14] : memref<8x128xf32, #tpu.memory_space<vmem>>, vector<1x128xf32>
    tpu.vector_store %arg3[%55, %c0_14], %54 {strides = array<i32>} : memref<8x128xf32, #tpu.memory_space<vmem>>, vector<1x128xf32>,
    %c8_i32_15 = arith.constant 8 : i32
    return
  }
  func.func @transform_0(%arg0: i32, %arg1: memref<16xi32, #tpu.memory_space<smem>>) -> (i32, i32) {
    %c0_i32 = arith.constant 0 : i32
    %c0_i32_0 = arith.constant 0 : i32
    %c0_i32_1 = arith.constant 0 : i32
    return %c0_i32, %c0_i32_0 : i32, i32
  }
  func.func @transform_1(%arg0: i32, %arg1: memref<16xi32, #tpu.memory_space<smem>>) -> (i32, i32) {
    %c0_i32 = arith.constant 0 : i32
    %c0_i32_0 = arith.constant 0 : i32
    return %arg0, %c0_i32 : i32, i32
  }
}

</mosaic_0001>

<bundles_post_ra>
// kernel: tpu_custom_call.1
= control target key start
LH: loop header
LB: loop body
LE: loop exit
PB: predicated region body
PF: predicated region fallthrough
CT: control target
= control target key end

     0   :  { %s575_s0 = inlined_call_operand.hbm [shape: s32[16], index: 0, kind: input, shape index: {}]   ;;  %s576_s1 = inlined_call_operand.hbm [shape: f32[128,128], index: 1, kind: input, shape index: {}]   ;;  %s577_s2 = inlined_call_operand.hbm [shape: f32[16,128], index: 2, kind: output, shape index: {}]  }
   0x1   :  { %s300_s11 = scalar_lea.hbm %s575_s0, 16 }
   0x2   :  { %p301_p0 = scmp.ne.s32.totalorder %s575_s0, %s300_s11  ;;  %p304_p1 = scmp.lt.u32.totalorder %s300_s11, %s575_s0 }
   0x4   :  { %p306_p2 = pnand %p304_p1, %p301_p0 }
   0x6   :  { %309 = shalt.err (!%p306_p2)  }
   0x7   :  { %s408_s16 = smov [#allocation3]  }
   0x8   :  { %8 = dma.hbm_to_smem %s575_s0, 16, %s408_s16, [#allocation2] }
   0x9   :  { %382 = dma.done.wait [#allocation2], 16 }
   0xa   :  { %383 = vsyncadd [#allocation2], 4294967280 }
   0xb   :  { %10 = sfence }
   0xc   :  { %11 = vsyncpa [#allocation5], 0 }
   0xd   :  { %12 = vsyncpa [#allocation6], 0 }
   0xe   :  { %14 = vsyncpa [#allocation6 + $0x1], 0  ;;  %s440_s19 = smov 0   ;;  %s442_s20 = smov 0  }
   0xf   :  { %s444_s21 = smov 0   ;;  %s446_s22 = smov 0  }
  0x10 LB: > { %s461_s0 = sadd.s32 4294967295, %s406_s22   ;;  %s236_s23 = sadd.s32 4294967294, %s406_s22   ;;  %s406_s22 = sphi %s446_s22, %s595_s22   ;;  %s402_s21 = sphi %s444_s21, %s594_s21   ;;  %s398_s20 = sphi %s442_s20, %s593_s20   ;;  %s394_s19 = sphi %s440_s19, %s592_s19  }
  0x11   : > { %s465_s24 = sadd.s32 1, %s406_s22   ;;  %s48_s25 = sadd.s32 1, %s402_s21 }
  0x12   : > { %s45_s26 = ssub.s32 %s406_s22, %s465_s24  ;;  %p58_p3 = scmp.ne.s32.totalorder %s402_s21, %s398_s20 }
  0x13   : > { %p46_p4 = scmp.eq.s32.totalorder %s45_s26, 0  ;;  %p59_p5 = scmp.eq.s32.totalorder %s461_s0, 1 }
  0x14   : > { %p64_p6 = scmp.ne.s32.totalorder %s398_s20, %s394_s19  ;;  %p65_p7 = scmp.eq.s32.totalorder %s236_s23, 1 }
  0x15   : > { %s476_s27 = scalar_select %p46_p4, %s402_s21, %s48_s25  }
  0x16   : > { %p478_p8 = por %p59_p5, %p58_p3  ;;  %p482_p9 = por %p65_p7, %p64_p6 }
  0x17   : > { %p237_p10 = scmp.ge.s32.totalorder %s406_s22, 1  ;;  %p72_p11 = scmp.lt.s32.totalorder %s406_s22, 3 }
  0x18   : > { %s582_s28 = scalar_select %p478_p8, 1, 0 }
  0x19   : > { %s583_s29 = scalar_select %p482_p9, 1, 0 }
  0x1a   : > { %p578_p12 = scmp.eq.s32.totalorder %s461_s0, 0  ;;  %p489_p13 = pnand %p237_p10, %p72_p11 }
  0x1b   : > { %s409_s3 = smov [#allocation4]   ;;  %s310_s8 = scalar_lea.hbm %s576_s1, 2048 }
  0x1c   : > { %s584_s30 = scalar_select %p489_p13, 1, 0 }
  0x1d   : > { %s84_s4 = sshll.u32 %s409_s3, 4  ;;  %p253_p0 = pneg %p489_p13  ;;  %s85_s4 = int_to_ptr.vmem [resolvable:$true] %s84_s4 }
  0x1e   : > { %p311_p2 = scmp.ne.s32.totalorder %s576_s1, %s310_s8  ;;  %p317_p6 = scmp.lt.u32.totalorder %s310_s8, %s576_s1 }
  0x1f   : > { %p497_p1 = pnand %p578_p12, %p253_p0 }
  0x21   : > { %p312_p3 = pneg %p497_p1 }
  0x23   : > { %p313_p4 = pnand %p312_p3, %p311_p2 }
  0x25   : > { %p314_p5 = pneg %p313_p4 }
  0x27   : > { %p319_p7 = pnand %p317_p6, %p314_p5 }
  0x29   : > { %322 = shalt.err (!%p319_p7)
}
  0x2a   : > { %s323_s13 = scalar_lea.vmem %s85_s4, 2048  ;;  %p331_p12 = scmp.lt.s32.totalorder %s85_s4, %s85_s4 }
  0x2b   : > { %p324_p10 = scmp.ne.s32.totalorder %s85_s4, %s323_s13  ;;  %p332_p9 = scmp.lt.s32.totalorder %s323_s13, %s323_s13 }
  0x2d   : > { %p326_p11 = pnand %p324_p10, %p312_p3  ;;  %p333_p8 = por %p332_p9, %p331_p12 }
  0x2f   : > { %p327_p0 = pneg %p326_p11 }
  0x31   : > { %p334_p13 = pnand %p333_p8, %p327_p0 }
  0x33   : > { %337 = shalt.err (!%p334_p13)
}
  0x34   : > { %s410_s14 = smov 128   ;;  %s411_s15 = smov 8  }
  0x35   : > { %256 = dma.hbm_to_vmem [thread:$0]  (!%p497_p1), %s576_s1, 2048, %s85_s4, [#allocation5], %s410_s14, %s410_s14, %s411_s15  }
  0x36   : > { %p586_p2 = scmp.ne.s32.totalorder %s584_s30, 0 }
  0x37   : > { %p587_p4 = scmp.eq.s32.totalorder (!%p586_p2), %s461_s0, 0 }
  0x38   : > { %100 = sbr.rel (%p586_p2) target bundleno = 103 (0x67), region = 24 }
  0x3f   : > { %385 = dma.done.wait (%p587_p4), [#allocation5], 2048   ;;  %p588_p3 = pmov %p587_p4 }
  0x40   : > { %s581_s18 = sand.u32 1, %s398_s20   ;;  %s242_s23 = sshll.u32 %s461_s0, 3 }
  0x41   : > { %387 = vsyncadd (%p588_p3), [#allocation5], 4294965248  ;;  %s241_s25 = sshll.u32 %s581_s18, 3  ;;  %s116_s26 = sld [smem:[#allocation3 + %s242_s23]] }
  0x42   : > { %s120_s3 = sadd.s32 1, %s242_s23  ;;  %s125_s5 = sadd.s32 2, %s242_s23 }
  0x43   : > { %s121_s4 = sld [smem:[#allocation3 + %s120_s3]]  ;;  %s130_s30 = sadd.s32 3, %s242_s23 }
  0x44   : > { %s126_s6 = sld [smem:[#allocation3 + %s125_s5]]  ;;  %s135_s7 = sadd.s32 4, %s242_s23 }
  0x45   : > { %s131_s8 = sld [smem:[#allocation3 + %s130_s30]]  ;;  %s140_s10 = sadd.s32 5, %s242_s23 }
  0x46   : > { %s136_s9 = sld [smem:[#allocation3 + %s135_s7]]  ;;  %s145_s13 = sadd.s32 6, %s242_s23 }
  0x47   : > { %s117_s11 = scalar_lea.vmem [#allocation4], %s116_s26  ;;  %s141_s12 = sld [smem:[#allocation3 + %s140_s10]] }
  0x48   : > { %v118_v0 = vld [vmem:[%s117_s11] sm:$0x1]  ;;  %s114_s14 = scalar_lea.vmem [#allocation7], %s241_s25  ;;  %s146_s15 = sld [smem:[#allocation3 + %s145_s13]] }
  0x49   : > { %119 = vst [vmem:[%s114_s14] sm:$0x1] %v118_v0  ;;  %s150_s16 = sadd.s32 7, %s242_s23  ;;  %s122_s17 = scalar_lea.vmem [#allocation4], %s121_s4 }
  0x4a   : > { %v123_v1 = vld [vmem:[%s122_s17] sm:$0x1]  ;;  %s127_s18 = scalar_lea.vmem [#allocation4], %s126_s6  ;;  %s151_s3 = sld [smem:[#allocation3 + %s150_s16]] }
  0x4b   : > { %v128_v2 = vld [vmem:[%s127_s18] sm:$0x1]  ;;  %124 = vst [vmem:[%s114_s14 + $0x1] sm:$0x1] %v123_v1  ;;  %s132_s5 = scalar_lea.vmem [#allocation4], %s131_s8  ;;  %s244_s26 = sshll.u32 %s461_s0, 7 }
  0x4c   : > { %129 = vst [vmem:[%s114_s14 + $0x2] sm:$0x1] %v128_v2  ;;  %v133_v3 = vld [vmem:[%s132_s5] sm:$0x1]  ;;  %s137_s30 = scalar_lea.vmem [#allocation4], %s136_s9  ;;  %s169_s25 = sshll.u32 %s114_s14, 4  ;;  %s533_s25 = int_to_ptr.vmem [resolvable:$true] %s169_s25 }
  0x4d   : > { %v138_v4 = vld [vmem:[%s137_s30] sm:$0x1]  ;;  %134 = vst [vmem:[%s114_s14 + $0x3] sm:$0x1] %v133_v3  ;;  %s142_s7 = scalar_lea.vmem [#allocation4], %s141_s12  ;;  %s531_s6 = scalar_lea.hbm %s577_s2, %s244_s26 }
  0x4e   : > { %139 = vst [vmem:[%s114_s14 + $0x4] sm:$0x1] %v138_v4  ;;  %v143_v5 = vld [vmem:[%s142_s7] sm:$0x1]  ;;  %s147_s23 = scalar_lea.vmem [#allocation4], %s146_s15  ;;  %s589_s8 = sand.u32 1, %s398_s20  }
  0x4f   : > { %144 = vst [vmem:[%s114_s14 + $0x5] sm:$0x1] %v143_v5  ;;  %v148_v6 = vld [vmem:[%s147_s23] sm:$0x1]  ;;  %s156_s9 = scalar_lea.sflag [#allocation6], %s589_s8  ;;  %s338_s10 = scalar_lea.vmem %s533_s25, 128 }
  0x50   : > { %149 = vst [vmem:[%s114_s14 + $0x6] sm:$0x1] %v148_v6  ;;  %s152_s0 = scalar_lea.vmem [#allocation4], %s151_s3  ;;  %p339_p8 = scmp.ne.s32.totalorder %s533_s25, %s338_s10 }
  0x51   : > { %v153_v7 = vld [vmem:[%s152_s0] sm:$0x1]  ;;  %p590_p9 = scmp.ne.s32.totalorder %s582_s28, 0  ;;  %s412_s11 = smov [#allocation7]  }
  0x52   : > { %154 = vst [vmem:[%s114_s14 + $0x7] sm:$0x1] %v153_v7  ;;  %s342_s12 = sshll.u32 %s412_s11, 4  ;;  %s343_s12 = int_to_ptr.vmem [resolvable:$false] %s342_s12 }
  0x53   : > { %p340_p12 = pnand %p339_p8, %p590_p9  ;;  %s344_s13 = scalar_lea.vmem %s343_s12, 256 }
  0x54   : > { %p345_p1 = scmp.lt.s32.totalorder %s533_s25, %s343_s12  ;;  %p346_p5 = scmp.lt.s32.totalorder %s344_s13, %s338_s10 }
  0x55   : > { %p341_p13 = pneg %p340_p12 }
  0x56   : > { %p347_p6 = por %p346_p5, %p345_p1 }
  0x58   : > { %p348_p7 = pnand %p347_p6, %p341_p13 }
  0x5a   : > { %351 = shalt.err (!%p348_p7)
}
  0x5b   : > { %s352_s14 = scalar_lea.hbm %s531_s6, 128  ;;  %s356_s17 = scalar_lea.hbm %s577_s2, 256 }
  0x5c   : > { %p353_p10 = scmp.ne.s32.totalorder %s531_s6, %s352_s14  ;;  %p357_p2 = scmp.lt.u32.totalorder %s531_s6, %s577_s2 }
  0x5d   : > { %p358_p4 = scmp.lt.u32.totalorder %s356_s17, %s352_s14  ;;  %p360_p8 = scmp.lt.u32.totalorder %s352_s14, %s531_s6 }
  0x5e   : > { %p354_p11 = pnand %p353_p10, %p590_p9 }
  0x5f   : > { %p359_p3 = por %p358_p4, %p357_p2 }
  0x60   : > { %p355_p0 = pneg %p354_p11 }
  0x61   : > { %p361_p12 = por %p360_p8, %p359_p3 }
  0x63   : > { %p362_p13 = pnand %p361_p12, %p355_p0 }
  0x65   : > { %365 = shalt.err (!%p362_p13)
}
  0x66   : > { %251 = dma.vmem_to_hbm [thread:$0]  (%p590_p9), %s533_s25, 128, %s531_s6, %s156_s9  }
  0x67 PF: > { %p263_p1 = scmp.ge.s32.totalorder %s406_s22, 2  ;;  %s181_s30 = sand.u32 1, %s394_s19  }
  0x68   : > { %p591_p5 = scmp.ne.s32.totalorder %s583_s29, 0  ;;  %s182_s26 = scalar_lea.sflag [#allocation6], %s181_s30 }
  0x6a   : > { %p258_p6 = pnand %p263_p1, %p591_p5 }
  0x6c   : > { %389 = dma.done.wait (!%p258_p6), %s182_s26, 128  }
  0x6d   : > { %391 = vsyncadd (!%p258_p6), %s182_s26, 4294967168  ;;  %p17_p7 = scmp.ge.s32.totalorder %s465_s24, 4   ;;  %s592_s19 = smov %s398_s20 }
  0x6e   : > { %s593_s20 = smov %s402_s21  ;;  %s594_s21 = smov %s476_s27 }
  0x6f   : > { %s595_s22 = smov %s465_s24  ;;  %19 = sbr.rel (!%p17_p7) target bundleno = 16 (0x10), region = 69 }
  0x76   :  { %187 = vsyncpa [#allocation5], 1 }
  0x77   :  { %189 = vsyncpa [#allocation5 + $0x1], 1 }
  0x78   :  { %190 = vsyncpa [#allocation6], 1 }
  0x79   :  { %192 = vsyncpa [#allocation6 + $0x1], 1 }

</bundles_post_ra>
